<compile_context>
chip_gen: v7x
topology: tpu7x:2x2x1
jax: 0.10.0
libtpu: 0.0.40
codegen_flags: <defaults>
</compile_context>

<pallas_src>
import jax
import jax.numpy as jnp
from jax.experimental import pallas as pl
from jax.experimental.pallas import tpu as pltpu

_LANES = 128
_SUBLANES = 8


def _round_up(n, m):
    return (n + m - 1) // m * m


# ----------------------------- kernel bodies -----------------------------

def _mlp_body(x, w1, b1, w2, b2, mask):
    obs_dim = w1.shape[0]

    # ---- Linear 1: K is tiny (obs_dim=4) -> unrolled VPU broadcast-MACs; MXU kept for L2.
    h = b1 + x[:, 0:1] * w1[0:1, :]                  # [tb, hidden]
    for k in range(1, obs_dim):                      # static unroll
        h = h + x[:, k:k + 1] * w1[k:k + 1, :]

    # ---- Dropout(0.5) (training only): mask is pre-scaled to {0, 1/(1-p)}.
    if mask is not None:
        h = h * mask

    # ---- ReLU ----
    h = jnp.maximum(h, 0.0)

    # ---- Linear 2 on the MXU (K = hidden, N zero-padded to 128 lanes) ----
    return jnp.dot(h, w2, preferred_element_type=jnp.float32) + b2


def _eval_kernel(x_ref, w1_ref, b1_ref, w2_ref, b2_ref, o_ref):
    o_ref[...] = _mlp_body(x_ref[...], w1_ref[...], b1_ref[...],
                           w2_ref[...], b2_ref[...], None).astype(o_ref.dtype)


def _train_kernel(x_ref, mask_ref, w1_ref, b1_ref, w2_ref, b2_ref, o_ref):
    o_ref[...] = _mlp_body(x_ref[...], w1_ref[...], b1_ref[...],
                           w2_ref[...], b2_ref[...], mask_ref[...]).astype(o_ref.dtype)


# ----------------------------- wrapper -----------------------------

def _default_num_batch_blocks():
    # v7x has 2 TensorCores/chip -> exactly 2 "parallel" grid steps keeps both busy.
    # v5e/v6e (single TC): the grid is a serial loop, so 1 step minimizes fixed overhead.
    try:
        dev = jax.devices()[0]
        kind = (getattr(dev, "device_kind", "") or "").lower()
        if dev.platform == "tpu" and "v7" in kind:
            return 2
    except Exception:
        pass
    return 1


def prepare_params(w1, b1, w2, b2):
    """One-time parameter packing (hoisted out of the per-call forward path):
    biases as row vectors, w2/b2 zero-padded to a full 128-lane output width so the
    kernel's final store is an unmasked lane-dense vst."""
    action_dim = w2.shape[1]
    n_pad = _round_up(max(action_dim, 1), _LANES)
    return {
        "w1": w1,
        "b1": b1.reshape(1, -1),
        "w2": jnp.pad(w2, ((0, 0), (0, n_pad - action_dim))),
        "b2": jnp.pad(b2.reshape(1, -1), ((0, 0), (0, n_pad - action_dim))),
        "action_dim": action_dim,
        "n_pad": n_pad,
    }


def net_forward(x, params, *, training=False, rng=None, dropout_mask=None,
                num_batch_blocks=None):
    """y = relu(dropout(x @ w1 + b1)) @ w2 + b2  (dropout only when training=True).

    `dropout_mask`, if given, must hold the multiplicative factor applied after linear-1
    (0.0 for dropped units, 1/(1-p)=2.0 for kept units), shape [B, hidden]."""
    B, obs_dim = x.shape
    w1, b1, w2_p, b2_p = params["w1"], params["b1"], params["w2"], params["b2"]
    hidden = w1.shape[1]
    n_pad = params["n_pad"]
    action_dim = params["action_dim"]

    if num_batch_blocks is None:
        num_batch_blocks = _default_num_batch_blocks()
    num_batch_blocks = max(1, min(num_batch_blocks, pl.cdiv(B, _SUBLANES)))
    block_b = _round_up(pl.cdiv(B, num_batch_blocks), _SUBLANES)
    block_b = min(block_b, 2048)                 # VMEM safety cap for very large batches
    b_pad = _round_up(B, block_b)
    grid = (b_pad // block_b,)

    # Skip the pad entirely when the batch already matches (common case).
    x_p = x if b_pad == B else jnp.pad(x, ((0, b_pad - B), (0, 0)))

    # Logical (unpadded) cost hint for XLA's scheduler.
    flops = 2 * B * (obs_dim * hidden + hidden * action_dim)
    bytes_accessed = 4 * (x.size + w1.size + hidden + hidden * action_dim + action_dim
                          + B * action_dim)

    data_spec = lambda i: (i, 0)    # tiled over batch
    rep_spec = lambda i: (0, 0)     # replicated params
    param_specs = [
        pl.BlockSpec((obs_dim, hidden), rep_spec),
        pl.BlockSpec((1, hidden), rep_spec),
        pl.BlockSpec((hidden, n_pad), rep_spec),
        pl.BlockSpec((1, n_pad), rep_spec),
    ]

    if training:
        # TODO(synk): statistically equivalent to torch's Dropout(0.5) (Bernoulli keep +
        # 1/(1-p) scaling) but torch's exact RNG stream cannot be reproduced.  The mask is
        # generated with jax.random (portable to TPU and interpret mode) and pre-scaled so
        # the kernel needs a single VPU multiply.
        if dropout_mask is None:
            if rng is None:
                rng = jax.random.PRNGKey(0)
            keep = jax.random.bernoulli(rng, 0.5, (b_pad, hidden))
            mask = keep.astype(jnp.float32) * 2.0
        else:
            mask = dropout_mask.astype(jnp.float32)
            if mask.shape[0] != b_pad:
                mask = jnp.pad(mask, ((0, b_pad - mask.shape[0]), (0, 0)))
        kernel = _train_kernel
        inputs = (x_p, mask, w1, b1, w2_p, b2_p)
        in_specs = [pl.BlockSpec((block_b, obs_dim), data_spec),
                    pl.BlockSpec((block_b, hidden), data_spec)] + param_specs
    else:
        kernel = _eval_kernel
        inputs = (x_p, w1, b1, w2_p, b2_p)
        in_specs = [pl.BlockSpec((block_b, obs_dim), data_spec)] + param_specs

    out = pl.pallas_call(
        kernel,
        out_shape=jax.ShapeDtypeStruct((b_pad, n_pad), jnp.float32),
        grid=grid,
        in_specs=in_specs,
        out_specs=pl.BlockSpec((block_b, n_pad), data_spec),
        compiler_params=pltpu.CompilerParams(
            dimension_semantics=("parallel",)),      # shards batch across TCs on v7x
        cost_estimate=pl.CostEstimate(
            flops=flops, transcendentals=0, bytes_accessed=bytes_accessed),
    )(*inputs)

    # NOTE: a fused downstream consumer (e.g. DQN argmax / TD target) could read the padded
    # [b_pad, 128] block directly with a column mask and skip this slice + HBM readback.
    out = out[:, :action_dim]
    if b_pad != B:
        out = out[:B]
    return out


def init_params(key, obs_dim, action_dim, hidden_size):
    """Deterministic init mimicking PyTorch nn.Linear default:
    U(-1/sqrt(fan_in), 1/sqrt(fan_in)) for both weight and bias.
    Weights stored as [in, out] so the kernel computes x @ W (== x @ W_torch.T)."""
    k1, k2, k3, k4 = jax.random.split(key, 4)
    bound1 = 1.0 / jnp.sqrt(obs_dim)
    bound2 = 1.0 / jnp.sqrt(hidden_size)
    w1 = jax.random.uniform(k1, (obs_dim, hidden_size), jnp.float32, -bound1, bound1)
    b1 = jax.random.uniform(k2, (hidden_size,), jnp.float32, -bound1, bound1)
    w2 = jax.random.uniform(k3, (hidden_size, action_dim), jnp.float32, -bound2, bound2)
    b2 = jax.random.uniform(k4, (action_dim,), jnp.float32, -bound2, bound2)
    return w1, b1, w2, b2


if __name__ == "__main__":
    # CartPole-v1: obs_dim=4, action_dim=2; module default hidden_size=128.
    obs_dim, action_dim, hidden_size = 4, 2, 128
    batch = 32

    key = jax.random.PRNGKey(0)
    kx, kp = jax.random.split(key)
    x = jax.random.normal(kx, (batch, obs_dim), dtype=jnp.float32)
    w1, b1, w2, b2 = init_params(kp, obs_dim, action_dim, hidden_size)
    params = prepare_params(w1, b1, w2, b2)   # one-time padding/reshape, out of the hot path

    # Eval-mode forward (Dropout = identity) vs pure-JAX reference.
    out = net_forward(x, params)
    jax.block_until_ready(out)
    ref = jnp.maximum(x @ w1 + b1, 0.0) @ w2 + b2
    assert out.shape == (batch, action_dim)
    assert jnp.allclose(out, ref, atol=1e-4, rtol=1e-4)

    # Train-mode forward (Dropout(0.5) active) with an externally supplied mask so it can
    # be checked exactly against a pure-JAX reference.
    keep = jax.random.bernoulli(jax.random.PRNGKey(123), 0.5, (batch, hidden_size))
    mask = keep.astype(jnp.float32) * 2.0
    out_train = net_forward(x, params, training=True, dropout_mask=mask)
    jax.block_until_ready(out_train)
    ref_train = jnp.maximum((x @ w1 + b1) * mask, 0.0) @ w2 + b2
    assert out_train.shape == (batch, action_dim)
    assert jnp.allclose(out_train, ref_train, atol=1e-4, rtol=1e-4)

    # Train-mode with the internally generated mask (RNG path) — shape/finiteness smoke test.
    out_train2 = net_forward(x, params, training=True, rng=jax.random.PRNGKey(7))
    jax.block_until_ready(out_train2)
    assert out_train2.shape == (batch, action_dim)
    assert bool(jnp.all(jnp.isfinite(out_train2)))

    print("KERNEL_OK")
</pallas_src>

<mosaic_0001>
module attributes {stable_mosaic.version = 11 : i64} {
  func.func @_eval_kernel(%arg0: i32, %arg1: memref<32x4xf32, #tpu.memory_space<vmem>>, %arg2: memref<4x128xf32, #tpu.memory_space<vmem>>, %arg3: memref<1x128xf32, #tpu.memory_space<vmem>>, %arg4: memref<128x128xf32, #tpu.memory_space<vmem>>, %arg5: memref<1x128xf32, #tpu.memory_space<vmem>>, %arg6: memref<32x128xf32, #tpu.memory_space<vmem>>) attributes {dimension_semantics = [#tpu.dimension_semantics<parallel>], iteration_bounds = array<i64: 1>, scalar_prefetch = 0 : i64, scratch_operands = 0 : i64, tpu.core_type = #tpu.core_type<tc>, window_params = [{transform_indices = @transform_0, window_bounds = array<i64: 32, 4>}, {pipeline_mode = #tpu.pipeline_mode<synchronous>, transform_indices = @transform_1, window_bounds = array<i64: 4, 128>}, {pipeline_mode = #tpu.pipeline_mode<synchronous>, transform_indices = @transform_2, window_bounds = array<i64: 1, 128>}, {pipeline_mode = #tpu.pipeline_mode<synchronous>, transform_indices = @transform_3, window_bounds = array<i64: 128, 128>}, {pipeline_mode = #tpu.pipeline_mode<synchronous>, transform_indices = @transform_4, window_bounds = array<i64: 1, 128>}, {transform_indices = @transform_5, window_bounds = array<i64: 32, 128>}]} {
    %c0 = arith.constant 0 : index
    %c0_0 = arith.constant 0 : index
    %0 = vector.load %arg1[%c0, %c0_0] : memref<32x4xf32, #tpu.memory_space<vmem>>, vector<32x4xf32>
    %c0_1 = arith.constant 0 : index
    %c0_2 = arith.constant 0 : index
    %1 = vector.load %arg2[%c0_1, %c0_2] : memref<4x128xf32, #tpu.memory_space<vmem>>, vector<4x128xf32>
    %c0_3 = arith.constant 0 : index
    %c0_4 = arith.constant 0 : index
    %2 = vector.load %arg3[%c0_3, %c0_4] : memref<1x128xf32, #tpu.memory_space<vmem>>, vector<1x128xf32>
    %c0_5 = arith.constant 0 : index
    %c0_6 = arith.constant 0 : index
    %3 = vector.load %arg4[%c0_5, %c0_6] : memref<128x128xf32, #tpu.memory_space<vmem>>, vector<128x128xf32>
    %c0_7 = arith.constant 0 : index
    %c0_8 = arith.constant 0 : index
    %4 = vector.load %arg5[%c0_7, %c0_8] : memref<1x128xf32, #tpu.memory_space<vmem>>, vector<1x128xf32>
    %5 = vector.extract_strided_slice %0 {offsets = [0, 0], sizes = [32, 1], strides = [1, 1]} : vector<32x4xf32> to vector<32x1xf32>
    %6 = vector.extract_strided_slice %1 {offsets = [0, 0], sizes = [1, 128], strides = [1, 1]} : vector<4x128xf32> to vector<1x128xf32>
    %7 = vector.broadcast %5 : vector<32x1xf32> to vector<32x128xf32>
    %8 = vector.broadcast %6 : vector<1x128xf32> to vector<32x128xf32>
    %9 = arith.mulf %7, %8 : vector<32x128xf32>
    %10 = vector.broadcast %2 : vector<1x128xf32> to vector<32x128xf32>
    %11 = arith.addf %10, %9 : vector<32x128xf32>
    %12 = vector.extract_strided_slice %0 {offsets = [0, 1], sizes = [32, 1], strides = [1, 1]} : vector<32x4xf32> to vector<32x1xf32>
    %13 = vector.extract_strided_slice %1 {offsets = [1, 0], sizes = [1, 128], strides = [1, 1]} : vector<4x128xf32> to vector<1x128xf32>
    %14 = vector.broadcast %12 : vector<32x1xf32> to vector<32x128xf32>
    %15 = vector.broadcast %13 : vector<1x128xf32> to vector<32x128xf32>
    %16 = arith.mulf %14, %15 : vector<32x128xf32>
    %17 = arith.addf %11, %16 : vector<32x128xf32>
    %18 = vector.extract_strided_slice %0 {offsets = [0, 2], sizes = [32, 1], strides = [1, 1]} : vector<32x4xf32> to vector<32x1xf32>
    %19 = vector.extract_strided_slice %1 {offsets = [2, 0], sizes = [1, 128], strides = [1, 1]} : vector<4x128xf32> to vector<1x128xf32>
    %20 = vector.broadcast %18 : vector<32x1xf32> to vector<32x128xf32>
    %21 = vector.broadcast %19 : vector<1x128xf32> to vector<32x128xf32>
    %22 = arith.mulf %20, %21 : vector<32x128xf32>
    %23 = arith.addf %17, %22 : vector<32x128xf32>
    %24 = vector.extract_strided_slice %0 {offsets = [0, 3], sizes = [32, 1], strides = [1, 1]} : vector<32x4xf32> to vector<32x1xf32>
    %25 = vector.extract_strided_slice %1 {offsets = [3, 0], sizes = [1, 128], strides = [1, 1]} : vector<4x128xf32> to vector<1x128xf32>
    %26 = vector.broadcast %24 : vector<32x1xf32> to vector<32x128xf32>
    %27 = vector.broadcast %25 : vector<1x128xf32> to vector<32x128xf32>
    %28 = arith.mulf %26, %27 : vector<32x128xf32>
    %29 = arith.addf %23, %28 : vector<32x128xf32>
    %cst = arith.constant 0.000000e+00 : f32
    %30 = vector.broadcast %cst : f32 to vector<32x128xf32>
    %31 = arith.maximumf %29, %30 : vector<32x128xf32>
    %cst_9 = arith.constant dense<0.000000e+00> : vector<32x128xf32>
    %32 = tpu.matmul %31, %3, %cst_9 {dimension_numbers = #tpu.dot_dimension_numbers<[1], [0], [0], [1], [0, 0, 1, 1], [], []>} : vector<32x128xf32>, vector<128x128xf32>, vector<32x128xf32> -> vector<32x128xf32>
    %33 = vector.broadcast %4 : vector<1x128xf32> to vector<32x128xf32>
    %34 = arith.addf %32, %33 : vector<32x128xf32>
    %c0_10 = arith.constant 0 : index
    %c0_11 = arith.constant 0 : index
    %35 = vector.load %arg6[%c0_10, %c0_11] : memref<32x128xf32, #tpu.memory_space<vmem>>, vector<32x128xf32>
    tpu.vector_store %arg6[%c0_10, %c0_11], %34 {strides = array<i32>} : memref<32x128xf32, #tpu.memory_space<vmem>>, vector<32x128xf32>,
    return
  }
  func.func @transform_0(%arg0: i32) -> (i32, i32) {
    %c0_i32 = arith.constant 0 : i32
    %c0_i32_0 = arith.constant 0 : i32
    return %arg0, %c0_i32 : i32, i32
  }
  func.func @transform_1(%arg0: i32) -> (i32, i32) {
    %c0_i32 = arith.constant 0 : i32
    %c0_i32_0 = arith.constant 0 : i32
    %c0_i32_1 = arith.constant 0 : i32
    return %c0_i32, %c0_i32_0 : i32, i32
  }
  func.func @transform_2(%arg0: i32) -> (i32, i32) {
    %c0_i32 = arith.constant 0 : i32
    %c0_i32_0 = arith.constant 0 : i32
    %c0_i32_1 = arith.constant 0 : i32
    return %c0_i32, %c0_i32_0 : i32, i32
  }
  func.func @transform_3(%arg0: i32) -> (i32, i32) {
    %c0_i32 = arith.constant 0 : i32
    %c0_i32_0 = arith.constant 0 : i32
    %c0_i32_1 = arith.constant 0 : i32
    return %c0_i32, %c0_i32_0 : i32, i32
  }
  func.func @transform_4(%arg0: i32) -> (i32, i32) {
    %c0_i32 = arith.constant 0 : i32
    %c0_i32_0 = arith.constant 0 : i32
    %c0_i32_1 = arith.constant 0 : i32
    return %c0_i32, %c0_i32_0 : i32, i32
  }
  func.func @transform_5(%arg0: i32) -> (i32, i32) {
    %c0_i32 = arith.constant 0 : i32
    %c0_i32_0 = arith.constant 0 : i32
    return %arg0, %c0_i32 : i32, i32
  }
}

</mosaic_0001>

<bundles_post_ra>
// kernel: tpu_custom_call.1
= control target key start
LH: loop header
LB: loop body
LE: loop exit
PB: predicated region body
PF: predicated region fallthrough
CT: control target
= control target key end

     0   :  { %10 = vsyncpa [#allocation3], 0  ;;  %s569_s0 = inlined_call_operand.vmem [shape: f32[32,4], index: 0, kind: input, shape index: {}]   ;;  %s570_s1 = inlined_call_operand.vmem [shape: f32[4,128], index: 1, kind: input, shape index: {}]   ;;  %s571_s2 = inlined_call_operand.vmem [shape: f32[1,128], index: 2, kind: input, shape index: {}]   ;;  %s572_s3 = inlined_call_operand.hbm [shape: f32[128,128], index: 3, kind: input, shape index: {}]   ;;  %s573_s4 = inlined_call_operand.vmem [shape: f32[1,128], index: 4, kind: input, shape index: {}]   ;;  %s574_s5 = inlined_call_operand.hbm [shape: f32[32,128], index: 5, kind: output, shape index: {}]  }
   0x1   :  { %11 = vsyncpa [#allocation4], 0  ;;  %s468_s18 = smov [#allocation2]   ;;  %s420_s22 = scalar_lea.hbm %s572_s3, 2048 }
   0x2   :  { %s23_s19 = sshll.u32 %s468_s18, 4  ;;  %p421_p0 = scmp.ne.s32.totalorder %s572_s3, %s420_s22  ;;  %s24_s19 = int_to_ptr.vmem [resolvable:$true] %s23_s19 }
   0x3   :  { %p424_p1 = scmp.lt.u32.totalorder %s420_s22, %s572_s3 }
   0x5   :  { %p426_p2 = pnand %p424_p1, %p421_p0 }
   0x7   :  { %429 = shalt.err (!%p426_p2)
}
   0x8   :  { %s430_s27 = scalar_lea.vmem %s24_s19, 2048  ;;  %p435_p4 = scmp.lt.s32.totalorder %s24_s19, %s24_s19 }
   0x9   :  { %p431_p3 = scmp.ne.s32.totalorder %s24_s19, %s430_s27  ;;  %p436_p5 = scmp.lt.s32.totalorder %s430_s27, %s430_s27 }
   0xb   :  { %p437_p6 = por %p436_p5, %p435_p4 }
   0xd   :  { %p438_p7 = pnand %p437_p6, %p431_p3 }
   0xf   :  { %441 = shalt.err (!%p438_p7)
}
  0x10   :  { %s469_s28 = smov 128   ;;  %s470_s29 = smov 8  }
  0x11   :  { %29 = dma.hbm_to_vmem [thread:$0]  %s572_s3, 2048, %s24_s19, [#allocation3], %s469_s28, %s469_s28, %s470_s29  }
  0x12   :  { %464 = dma.done.wait [#allocation3], 2048  }
  0x13   :  { %465 = vsyncadd [#allocation3], 4294965248  ;;  %v471_v0 = vmov 0   ;;  %v524_v1 = vld [vmem:[%s569_s0 + $0x8] sm:$0xff]  ;;  %v35_v2 = vld [vmem:[%s569_s0] sm:$0xff]  ;;  %v472_v10 = vmov 1   ;;  %v78_v32 = vlaneseq }
  0x14   :  { %413 = vset.pattern.permute.xlu1 %v471_v0  ;;  %412 = vset.pattern.permute.xlu0 %v471_v0  ;;  %v38_v3 = vld [vmem:[%s569_s0 + $0x18] sm:$0xff]  ;;  %v536_v4 = vld [vmem:[%s569_s0 + $0x10] sm:$0xff]  ;;  %v41_v5 = vld [vmem:[#allocation2] sm:$0xff]  ;;  %v473_v18 = vmov 2   ;;  %v474_v22 = vmov 3   ;;  %s475_s17 = smov [#allocation5]  }
  0x15   :  { %65 = vperm.xlu1 %413, %v524_v1   ;;  %60 = vperm.xlu0 %412, %v35_v2   ;;  %v42_v6 = vld [vmem:[#allocation2 + $0x8] sm:$0xff]  ;;  %v43_v8 = vld [vmem:[#allocation2 + $0x10] sm:$0xff]  ;;  %v44_v9 = vld [vmem:[#allocation2 + $0x18] sm:$0xff]  ;;  %v79_v35 = vshrl.u32 %v78_v32, 7  ;;  %s284_s18 = sshll.u32 %s475_s17, 4  ;;  %s285_s18 = int_to_ptr.vmem [resolvable:$true] %s284_s18 }
  0x16   :  { %v356_v7 = vpack.c.bf16 %v42_v6, %v41_v5  ;;  %v360_v11 = vpack.c.bf16 %v44_v9, %v43_v8  ;;  %v45_v12 = vld [vmem:[#allocation2 + $0x20] sm:$0xff]  ;;  %v46_v13 = vld [vmem:[#allocation2 + $0x28] sm:$0xff]  ;;  %v47_v15 = vld [vmem:[#allocation2 + $0x30] sm:$0xff]  ;;  %s442_s19 = scalar_lea.vmem %s285_s18, 512  ;;  %p447_p9 = scmp.lt.s32.totalorder %s285_s18, %s285_s18 }
  0x17   :  { %v364_v14 = vpack.c.bf16 %v46_v13, %v45_v12  ;;  %v48_v16 = vld [vmem:[#allocation2 + $0x38] sm:$0xff]  ;;  %v49_v19 = vld [vmem:[#allocation2 + $0x40] sm:$0xff]  ;;  %v50_v20 = vld [vmem:[#allocation2 + $0x48] sm:$0xff]  ;;  %v80_v38 = vsub.s32 0, %v79_v35  ;;  %v114_v42 = vsub.s32 1, %v79_v35  ;;  %v142_v44 = vsub.s32 2, %v79_v35  ;;  %p443_p8 = scmp.ne.s32.totalorder %s285_s18, %s442_s19  ;;  %p448_p10 = scmp.lt.s32.totalorder %s442_s19, %s442_s19 }
  0x18   :  { %388 = vmatprep.subr.bf16.mxu1 %v356_v7  ;;  %357 = vmatprep.subr.bf16.mxu0 %v356_v7  ;;  %v368_v17 = vpack.c.bf16 %v48_v16, %v47_v15  ;;  %v372_v21 = vpack.c.bf16 %v50_v20, %v49_v19  ;;  %v51_v23 = vld [vmem:[#allocation2 + $0x50] sm:$0xff]  ;;  %v52_v24 = vld [vmem:[#allocation2 + $0x58] sm:$0xff]  ;;  %v53_v26 = vld [vmem:[#allocation2 + $0x60] sm:$0xff]  ;;  %v170_v50 = vsub.s32 3, %v79_v35 }
  0x19   :  { %75 = vperm.xlu1 %413, %v38_v3   ;;  %70 = vperm.xlu0 %412, %v536_v4   ;;  %v376_v25 = vpack.c.bf16 %v52_v24, %v51_v23  ;;  %v54_v27 = vld [vmem:[#allocation2 + $0x68] sm:$0xff]  ;;  %v55_v29 = vld [vmem:[#allocation2 + $0x70] sm:$0xff]  ;;  %v56_v30 = vld [vmem:[#allocation2 + $0x78] sm:$0xff]  ;;  %p449_p11 = por %p448_p10, %p447_p9 }
  0x1a   :  { %396 = vmatpush3.bf16.msra.mxu1 %v356_v7  ;;  %359 = vmatpush3.bf16.msra.mxu0 %v356_v7  ;;  %v380_v28 = vpack.c.bf16 %v54_v27, %v53_v26  ;;  %v384_v31 = vpack.c.bf16 %v56_v30, %v55_v29  ;;  %v39_v39 = vld [vmem:[%s570_s1] sm:$0xf] }
  0x1b   :  { %389 = vmatprep.subr.bf16.mxu1 %v360_v11  ;;  %361 = vmatprep.subr.bf16.mxu0 %v360_v11  ;;  %v81_v43 = vrot.slane %v39_v39, %v80_v38  ;;  %v115_v48 = vrot.slane %v39_v39, %v114_v42  ;;  %v143_v49 = vrot.slane %v39_v39, %v142_v44  ;;  %v296_v51 = vld [vmem:[%s571_s2] ss:$0 sm:$0xff]  ;;  %p450_p12 = pnand %p449_p11, %p443_p8 }
  0x1c   :  { %v171_v57 = vrot.slane %v39_v39, %v170_v50  ;;  %v297_v32 = vld [vmem:[%s573_s4] ss:$0 sm:$0xff] }
  0x1d   :  { %415 = vset.pattern.permute.xlu1 %v472_v10  ;;  %414 = vset.pattern.permute.xlu0 %v472_v10 }
  0x1e   :  { %105 = vperm.xlu1 %415, %v536_v4   ;;  %97 = vperm.xlu0 %414, %v35_v2  }
  0x1f   :  { %397 = vmatpush3.bf16.msra.mxu1 %v360_v11  ;;  %363 = vmatpush3.bf16.msra.mxu0 %v360_v11 }
  0x20   :  { %390 = vmatprep.subr.bf16.mxu1 %v364_v14  ;;  %365 = vmatprep.subr.bf16.mxu0 %v364_v14 }
  0x22   :  { %101 = vperm.xlu1 %415, %v524_v1   ;;  %109 = vperm.xlu0 %414, %v38_v3  }
  0x23   :  { %398 = vmatpush3.bf16.msra.mxu1 %v364_v14  ;;  %367 = vmatpush3.bf16.msra.mxu0 %v364_v14 }
  0x24   :  { %391 = vmatprep.subr.bf16.mxu1 %v368_v17  ;;  %369 = vmatprep.subr.bf16.mxu0 %v368_v17 }
  0x26   :  { %416 = vset.pattern.permute.xlu1 %v473_v18  ;;  %417 = vset.pattern.permute.xlu0 %v473_v18 }
  0x27   :  { %125 = vperm.xlu1 %416, %v35_v2   ;;  %133 = vperm.xlu0 %417, %v536_v4  }
  0x28   :  { %399 = vmatpush3.bf16.msra.mxu1 %v368_v17  ;;  %371 = vmatpush3.bf16.msra.mxu0 %v368_v17 }
  0x29   :  { %392 = vmatprep.subr.bf16.mxu1 %v372_v21  ;;  %373 = vmatprep.subr.bf16.mxu0 %v372_v21 }
  0x2b   :  { %129 = vperm.xlu1 %416, %v524_v1   ;;  %418 = vset.pattern.permute.xlu0 %v474_v22 }
  0x2c   :  { %153 = vperm.xlu0 %418, %v35_v2   ;;  %400 = vmatpush3.bf16.msra.mxu1 %v372_v21 }
  0x2d   :  { %375 = vmatpush3.bf16.msra.mxu0 %v372_v21  ;;  %393 = vmatprep.subr.bf16.mxu1 %v376_v25 }
  0x2e   :  { %377 = vmatprep.subr.bf16.mxu0 %v376_v25 }
  0x2f   :  { %137 = vperm.xlu1 %416, %v38_v3  }
  0x30   :  { %165 = vperm.xlu0 %418, %v38_v3   ;;  %401 = vmatpush3.bf16.msra.mxu1 %v376_v25 }
  0x31   :  { %379 = vmatpush3.bf16.msra.mxu0 %v376_v25  ;;  %394 = vmatprep.subr.bf16.mxu1 %v380_v28 }
  0x32   :  { %381 = vmatprep.subr.bf16.mxu0 %v380_v28 }
  0x33   :  { %419 = vset.pattern.permute.xlu1 %v474_v22 }
  0x34   :  { %161 = vperm.xlu1 %419, %v536_v4   ;;  %402 = vmatpush3.bf16.msra.mxu1 %v380_v28 }
  0x35   :  { %383 = vmatpush3.bf16.msra.mxu0 %v380_v28  ;;  %395 = vmatprep.subr.bf16.mxu1 %v384_v31 }
  0x36   :  { %385 = vmatprep.subr.bf16.mxu0 %v384_v31 }
  0x38   :  { %157 = vperm.xlu1 %419, %v524_v1   ;;  %403 = vmatpush3.bf16.msra.mxu1 %v384_v31 }
  0x39   :  { %387 = vmatpush3.bf16.msra.mxu0 %v384_v31 }
  0x94   :  { %v66_v33 = vpop.permute.xlu1 %65  ;;  %v61_v34 = vpop.permute.xlu0 %60 }
  0x95   :  { %v82_v47 = vmul.f32 %v81_v43, %v61_v34  ;;  %v83_v10 = vmul.f32 %v81_v43, %v66_v33 }
  0x97   :  { %v92_v52 = vadd.f32 %v296_v51, %v82_v47  ;;  %v93_v18 = vadd.f32 %v296_v51, %v83_v10 }
  0x98   :  { %v76_v36 = vpop.permute.xlu1 %75  ;;  %v71_v37 = vpop.permute.xlu0 %70 }
  0x99   :  { %v85_v58 = vmul.f32 %v81_v43, %v76_v36  ;;  %v84_v59 = vmul.f32 %v81_v43, %v71_v37 }
  0x9b   :  { %v95_v2 = vadd.f32 %v296_v51, %v85_v58  ;;  %v94_v3 = vadd.f32 %v296_v51, %v84_v59 }
  0x9d   :  { %v106_v40 = vpop.permute.xlu1 %105  ;;  %v98_v41 = vpop.permute.xlu0 %97 }
  0x9e   :  { %v116_v53 = vmul.f32 %v115_v48, %v98_v41  ;;  %v118_v4 = vmul.f32 %v115_v48, %v106_v40 }
  0xa0   :  { %v120_v60 = vadd.f32 %v116_v53, %v92_v52  ;;  %v122_v15 = vadd.f32 %v118_v4, %v94_v3 }
  0xa1   :  { %v102_v45 = vpop.permute.xlu1 %101  ;;  %v110_v46 = vpop.permute.xlu0 %109 }
  0xa2   :  { %v119_v62 = vmul.f32 %v115_v48, %v110_v46  ;;  %v117_v16 = vmul.f32 %v115_v48, %v102_v45 }
  0xa4   :  { %v123_v7 = vadd.f32 %v119_v62, %v95_v2  ;;  %v121_v23 = vadd.f32 %v117_v16, %v93_v18 }
  0xa6   :  { %v126_v54 = vpop.permute.xlu1 %125  ;;  %v134_v55 = vpop.permute.xlu0 %133 }
  0xa7   :  { %v144_v56 = vmul.f32 %v143_v49, %v126_v54  ;;  %v146_v11 = vmul.f32 %v143_v49, %v134_v55 }
  0xa9   :  { %v148_v1 = vadd.f32 %v144_v56, %v120_v60  ;;  %v150_v21 = vadd.f32 %v146_v11, %v122_v15 }
  0xaa   :  { %v130_v61 = vpop.permute.xlu1 %129 }
  0xab   :  { %v154_v63 = vpop.permute.xlu0 %153  ;;  %v145_v19 = vmul.f32 %v143_v49, %v130_v61 }
  0xac   :  { %v172_v0 = vmul.f32 %v171_v57, %v154_v63 }
  0xad   :  { %v149_v26 = vadd.f32 %v145_v19, %v121_v23 }
  0xae   :  { %v138_v5 = vpop.permute.xlu1 %137  ;;  %v176_v6 = vadd.f32 %v172_v0, %v148_v1 }
  0xaf   :  { %v147_v8 = vmul.f32 %v143_v49, %v138_v5  ;;  %v166_v9 = vpop.permute.xlu0 %165 }
  0xb0   :  { %v180_v12 = vmax.f32 %v176_v6, 0.0  ;;  %v175_v14 = vmul.f32 %v171_v57, %v166_v9 }
  0xb1   :  { %v151_v13 = vadd.f32 %v147_v8, %v123_v7 }
  0xb2   :  { %350 = vmatprep.mubr.f32.mxu0 %v180_v12 }
  0xb3   :  { %v162_v17 = vpop.permute.xlu1 %161  ;;  %v179_v22 = vadd.f32 %v175_v14, %v151_v13 }
  0xb4   :  { %v174_v20 = vmul.f32 %v171_v57, %v162_v17 }
  0xb5   :  { %v183_v29 = vmax.f32 %v179_v22, 0.0 }
  0xb6   :  { %v178_v24 = vadd.f32 %v174_v20, %v150_v21 }
  0xb7   :  { %v158_v25 = vpop.permute.xlu1 %157 }
  0xb8   :  { %v173_v27 = vmul.f32 %v171_v57, %v158_v25  ;;  %v182_v28 = vmax.f32 %v178_v24, 0.0 }
  0xba   :  { %v177_v30 = vadd.f32 %v173_v27, %v149_v26  ;;  %353 = vmatprep.mubr.f32.mxu1 %v182_v28 }
  0xbb   :  { %354 = vmatmul.mubr.f32.vlgmr.msra.gmra.mrb[0].mxu1 %v183_v29 }
  0xbc   :  { %v181_v31 = vmax.f32 %v177_v30, 0.0 }
  0xbe   :  { %351 = vmatmul.mubr.f32.vlgmr.msra.gmra.mrb[0].mxu0 %v181_v31 }
 0x18e   :  { %v355_v33 = vpop.f32.mrb[0].mxu1 }
 0x18f   :  { %v272_v34 = vadd.f32 %v355_v33, %v297_v32  ;;  %v266_v35 = vpop.f32.mrb[1].mxu1 }
 0x190   :  { %v267_v36 = vadd.f32 %v297_v32, %v266_v35 }
 0x191   :  { %278 = vst [vmem:[#allocation5 + $0x18] sm:$0xff] %v272_v34  ;;  %v352_v37 = vpop.f32.mrb[0].mxu0 }
 0x192   :  { %277 = vst [vmem:[#allocation5 + $0x10] sm:$0xff] %v267_v36  ;;  %v262_v38 = vadd.f32 %v352_v37, %v297_v32  ;;  %v256_v39 = vpop.f32.mrb[1].mxu0 }
 0x193   :  { %v257_v40 = vadd.f32 %v297_v32, %v256_v39 }
 0x194   :  { %276 = vst [vmem:[#allocation5 + $0x8] sm:$0xff] %v262_v38 }
 0x195   :  { %275 = vst [vmem:[#allocation5] sm:$0xff] %v257_v40 }
 0x196   :  { %453 = shalt.err (!%p450_p12)
}
 0x197   :  { %s454_s21 = scalar_lea.hbm %s574_s5, 512 }
 0x198   :  { %p455_p13 = scmp.ne.s32.totalorder %s574_s5, %s454_s21  ;;  %p458_p0 = scmp.lt.u32.totalorder %s454_s21, %s574_s5 }
 0x19a   :  { %p460_p1 = pnand %p458_p0, %p455_p13 }
 0x19c   :  { %463 = shalt.err (!%p460_p1)
}
 0x19d   :  { %290 = dma.vmem_to_hbm [thread:$0]  %s285_s18, 512, %s574_s5, [#allocation4], %s469_s28, %s469_s28, %s470_s29  }
 0x19e   :  { %466 = dma.done.wait [#allocation4], 512  }
 0x19f   :  { %467 = vsyncadd [#allocation4], 4294966784 }
 0x1a0   :  { %294 = vsyncpa [#allocation3], 1 }
 0x1a1   :  { %295 = vsyncpa [#allocation4], 1 }

</bundles_post_ra>
